<compile_context>
chip_gen: v7x
topology: tpu7x:2x2x1
jax: 0.10.0
libtpu: 0.0.40
codegen_flags: <defaults>
</compile_context>

<pallas_src>
import functools

import jax
import jax.numpy as jnp
from jax.experimental import pallas as pl
from jax.experimental.pallas import tpu as pltpu

NEG_SLOPE = 0.01  # nn.LeakyReLU() default

# (in_features, out_features) of the real layers and their lane-aligned padded shapes.
REAL_DIMS = [(256, 180), (180, 126), (126, 88), (88, 2)]
PAD_DIMS = [(256, 256), (256, 128), (128, 128), (128, 128)]
OUT_PAD = PAD_DIMS[-1][1]  # 128 — lane-dense padded output width


def _leaky_relu(x):
    return jnp.where(x > 0, x, NEG_SLOPE * x)


def mlp_kernel(x_ref,
               w1_ref, b1_ref,
               w2_ref, b2_ref,
               w3_ref, b3_ref,
               w4_ref, b4_ref,
               o_ref):
    # Whole hot path (4 matmuls + bias + LeakyReLU) runs inside this kernel.
    # Weights may be bf16; accumulation and elementwise math stay in f32.
    cdt = w1_ref.dtype
    x = x_ref[...].astype(cdt)

    h = jnp.dot(x, w1_ref[...], preferred_element_type=jnp.float32) + b1_ref[...]
    h = _leaky_relu(h).astype(cdt)          # dropout (p=0.25) = identity in eval

    h = jnp.dot(h, w2_ref[...], preferred_element_type=jnp.float32) + b2_ref[...]
    h = _leaky_relu(h).astype(cdt)

    h = jnp.dot(h, w3_ref[...], preferred_element_type=jnp.float32) + b3_ref[...]
    h = _leaky_relu(h).astype(cdt)

    h = jnp.dot(h, w4_ref[...], preferred_element_type=jnp.float32) + b4_ref[...]
    o_ref[...] = h.astype(o_ref.dtype)      # lane-dense (bt, 128) store


def _pad2(a, shape):
    return jnp.pad(a, ((0, shape[0] - a.shape[0]), (0, shape[1] - a.shape[1])))


def _pad_params(params, compute_dtype):
    """Zero-pad weights/biases to lane-aligned shapes; weights cast to compute_dtype."""
    padded = []
    for idx, (ki, no) in enumerate(PAD_DIMS, start=1):
        w = _pad2(params[f"w{idx}"], (ki, no)).astype(compute_dtype)
        b = _pad2(params[f"b{idx}"], (1, no)).astype(jnp.float32)  # bias add in f32
        padded += [w, b]
    return padded


@functools.partial(jax.jit, static_argnames=("batch_tile", "compute_dtype"))
def discriminator_forward(x, params, *, batch_tile=512, compute_dtype=jnp.float32):
    """x: (B, 256) float32.  params: dict of transposed (in,out) weights / (1,out) biases."""
    B, D_in = x.shape
    assert D_in == 256

    # Real batch tile: multiple of 8 (sublane), capped so tiny batches still work.
    bt = min(int(batch_tile), ((B + 7) // 8) * 8)
    bt = max(8, ((bt + 7) // 8) * 8)
    B_pad = ((B + bt - 1) // bt) * bt
    if B_pad != B:
        x = jnp.pad(x, ((0, B_pad - B), (0, 0)))

    (w1, b1, w2, b2, w3, b3, w4, b4) = _pad_params(params, compute_dtype)

    def full_spec(shape):
        # Weights/biases are small and block-index-constant -> resident in VMEM.
        return pl.BlockSpec(shape, lambda i: (0,) * len(shape))

    out_padded = pl.pallas_call(
        mlp_kernel,
        out_shape=jax.ShapeDtypeStruct((B_pad, OUT_PAD), jnp.float32),
        grid_spec=pltpu.PrefetchScalarGridSpec(
            num_scalar_prefetch=0,
            grid=(B_pad // bt,),
            in_specs=[
                pl.BlockSpec((bt, 256), lambda i: (i, 0)),
                full_spec(w1.shape), full_spec(b1.shape),
                full_spec(w2.shape), full_spec(b2.shape),
                full_spec(w3.shape), full_spec(b3.shape),
                full_spec(w4.shape), full_spec(b4.shape),
            ],
            out_specs=pl.BlockSpec((bt, OUT_PAD), lambda i: (i, 0)),
        ),
        compiler_params=pltpu.CompilerParams(
            dimension_semantics=("parallel",),
            vmem_limit_bytes=32 * 1024 * 1024,
        ),
    )(x, w1, b1, w2, b2, w3, b3, w4, b4)

    # Drop batch padding and the 126 zero-padded output lanes.
    return out_padded[:B, :2]


def init_params(key):
    """Deterministic init mimicking nn.Linear's U(-1/sqrt(fan_in), 1/sqrt(fan_in)).
    Weights are stored as (in_features, out_features) for the kernel."""
    params = {}
    for idx, (fan_in, fan_out) in enumerate(REAL_DIMS, start=1):
        key, kw, kb = jax.random.split(key, 3)
        bound = 1.0 / (fan_in ** 0.5)
        params[f"w{idx}"] = jax.random.uniform(
            kw, (fan_in, fan_out), jnp.float32, -bound, bound)
        params[f"b{idx}"] = jax.random.uniform(
            kb, (1, fan_out), jnp.float32, -bound, bound)
    return params


def reference_forward(x, params):
    h = _leaky_relu(x @ params["w1"] + params["b1"])
    h = _leaky_relu(h @ params["w2"] + params["b2"])
    h = _leaky_relu(h @ params["w3"] + params["b3"])
    return h @ params["w4"] + params["b4"]


if __name__ == "__main__":
    key = jax.random.PRNGKey(0)
    kx, kx2, kp = jax.random.split(key, 3)
    params = init_params(kp)

    # Small shapes (module forces feature dim 256).
    B = 8
    x = jax.random.normal(kx, (B, 256), jnp.float32)
    out = jax.block_until_ready(discriminator_forward(x, params))
    ref = reference_forward(x, params)
    assert out.shape == (B, 2)
    assert jnp.allclose(out, ref, atol=1e-4, rtol=1e-4)

    # Non-multiple batch exercises the batch padding + multi-step grid path.
    B2 = 300
    x2 = jax.random.normal(kx2, (B2, 256), jnp.float32)
    out2 = jax.block_until_ready(
        discriminator_forward(x2, params, batch_tile=128))
    ref2 = reference_forward(x2, params)
    assert out2.shape == (B2, 2)
    assert jnp.allclose(out2, ref2, atol=1e-4, rtol=1e-4)

    print("KERNEL_OK")
</pallas_src>

<mosaic_0001>
module attributes {stable_mosaic.version = 11 : i64} {
  func.func @mlp_kernel(%arg0: i32, %arg1: memref<8x256xf32, #tpu.memory_space<vmem>>, %arg2: memref<256x256xf32, #tpu.memory_space<vmem>>, %arg3: memref<1x256xf32, #tpu.memory_space<vmem>>, %arg4: memref<256x128xf32, #tpu.memory_space<vmem>>, %arg5: memref<1x128xf32, #tpu.memory_space<vmem>>, %arg6: memref<128x128xf32, #tpu.memory_space<vmem>>, %arg7: memref<1x128xf32, #tpu.memory_space<vmem>>, %arg8: memref<128x128xf32, #tpu.memory_space<vmem>>, %arg9: memref<1x128xf32, #tpu.memory_space<vmem>>, %arg10: memref<8x128xf32, #tpu.memory_space<vmem>>) attributes {dimension_semantics = [#tpu.dimension_semantics<parallel>], iteration_bounds = array<i64: 1>, scalar_prefetch = 0 : i64, scratch_operands = 0 : i64, tpu.core_type = #tpu.core_type<tc>, window_params = [{transform_indices = @transform_0, window_bounds = array<i64: 8, 256>}, {pipeline_mode = #tpu.pipeline_mode<synchronous>, transform_indices = @transform_1, window_bounds = array<i64: 256, 256>}, {pipeline_mode = #tpu.pipeline_mode<synchronous>, transform_indices = @transform_2, window_bounds = array<i64: 1, 256>}, {pipeline_mode = #tpu.pipeline_mode<synchronous>, transform_indices = @transform_3, window_bounds = array<i64: 256, 128>}, {pipeline_mode = #tpu.pipeline_mode<synchronous>, transform_indices = @transform_4, window_bounds = array<i64: 1, 128>}, {pipeline_mode = #tpu.pipeline_mode<synchronous>, transform_indices = @transform_5, window_bounds = array<i64: 128, 128>}, {pipeline_mode = #tpu.pipeline_mode<synchronous>, transform_indices = @transform_6, window_bounds = array<i64: 1, 128>}, {pipeline_mode = #tpu.pipeline_mode<synchronous>, transform_indices = @transform_7, window_bounds = array<i64: 128, 128>}, {pipeline_mode = #tpu.pipeline_mode<synchronous>, transform_indices = @transform_8, window_bounds = array<i64: 1, 128>}, {transform_indices = @transform_9, window_bounds = array<i64: 8, 128>}]} {
    %c0 = arith.constant 0 : index
    %c0_0 = arith.constant 0 : index
    %0 = vector.load %arg1[%c0, %c0_0] : memref<8x256xf32, #tpu.memory_space<vmem>>, vector<8x256xf32>
    %c0_1 = arith.constant 0 : index
    %c0_2 = arith.constant 0 : index
    %1 = vector.load %arg2[%c0_1, %c0_2] : memref<256x256xf32, #tpu.memory_space<vmem>>, vector<256x256xf32>
    %cst = arith.constant dense<0.000000e+00> : vector<8x256xf32>
    %2 = tpu.matmul %0, %1, %cst {dimension_numbers = #tpu.dot_dimension_numbers<[1], [0], [0], [1], [0, 0, 1, 1], [], []>} : vector<8x256xf32>, vector<256x256xf32>, vector<8x256xf32> -> vector<8x256xf32>
    %c0_3 = arith.constant 0 : index
    %c0_4 = arith.constant 0 : index
    %3 = vector.load %arg3[%c0_3, %c0_4] : memref<1x256xf32, #tpu.memory_space<vmem>>, vector<1x256xf32>
    %4 = vector.broadcast %3 : vector<1x256xf32> to vector<8x256xf32>
    %5 = arith.addf %2, %4 : vector<8x256xf32>
    %cst_5 = arith.constant 0.000000e+00 : f32
    %6 = vector.broadcast %cst_5 : f32 to vector<8x256xf32>
    %7 = arith.cmpf ogt, %5, %6 : vector<8x256xf32>
    %cst_6 = arith.constant 0.00999999977 : f32
    %8 = vector.broadcast %cst_6 : f32 to vector<8x256xf32>
    %9 = arith.mulf %8, %5 : vector<8x256xf32>
    %10 = arith.select %7, %5, %9 : vector<8x256xi1>, vector<8x256xf32>
    %c0_7 = arith.constant 0 : index
    %c0_8 = arith.constant 0 : index
    %11 = vector.load %arg4[%c0_7, %c0_8] : memref<256x128xf32, #tpu.memory_space<vmem>>, vector<256x128xf32>
    %cst_9 = arith.constant dense<0.000000e+00> : vector<8x128xf32>
    %12 = tpu.matmul %10, %11, %cst_9 {dimension_numbers = #tpu.dot_dimension_numbers<[1], [0], [0], [1], [0, 0, 1, 1], [], []>} : vector<8x256xf32>, vector<256x128xf32>, vector<8x128xf32> -> vector<8x128xf32>
    %c0_10 = arith.constant 0 : index
    %c0_11 = arith.constant 0 : index
    %13 = vector.load %arg5[%c0_10, %c0_11] : memref<1x128xf32, #tpu.memory_space<vmem>>, vector<1x128xf32>
    %14 = vector.broadcast %13 : vector<1x128xf32> to vector<8x128xf32>
    %15 = arith.addf %12, %14 : vector<8x128xf32>
    %cst_12 = arith.constant 0.000000e+00 : f32
    %16 = vector.broadcast %cst_12 : f32 to vector<8x128xf32>
    %17 = arith.cmpf ogt, %15, %16 : vector<8x128xf32>
    %cst_13 = arith.constant 0.00999999977 : f32
    %18 = vector.broadcast %cst_13 : f32 to vector<8x128xf32>
    %19 = arith.mulf %18, %15 : vector<8x128xf32>
    %20 = arith.select %17, %15, %19 : vector<8x128xi1>, vector<8x128xf32>
    %c0_14 = arith.constant 0 : index
    %c0_15 = arith.constant 0 : index
    %21 = vector.load %arg6[%c0_14, %c0_15] : memref<128x128xf32, #tpu.memory_space<vmem>>, vector<128x128xf32>
    %cst_16 = arith.constant dense<0.000000e+00> : vector<8x128xf32>
    %22 = tpu.matmul %20, %21, %cst_16 {dimension_numbers = #tpu.dot_dimension_numbers<[1], [0], [0], [1], [0, 0, 1, 1], [], []>} : vector<8x128xf32>, vector<128x128xf32>, vector<8x128xf32> -> vector<8x128xf32>
    %c0_17 = arith.constant 0 : index
    %c0_18 = arith.constant 0 : index
    %23 = vector.load %arg7[%c0_17, %c0_18] : memref<1x128xf32, #tpu.memory_space<vmem>>, vector<1x128xf32>
    %24 = vector.broadcast %23 : vector<1x128xf32> to vector<8x128xf32>
    %25 = arith.addf %22, %24 : vector<8x128xf32>
    %cst_19 = arith.constant 0.000000e+00 : f32
    %26 = vector.broadcast %cst_19 : f32 to vector<8x128xf32>
    %27 = arith.cmpf ogt, %25, %26 : vector<8x128xf32>
    %cst_20 = arith.constant 0.00999999977 : f32
    %28 = vector.broadcast %cst_20 : f32 to vector<8x128xf32>
    %29 = arith.mulf %28, %25 : vector<8x128xf32>
    %30 = arith.select %27, %25, %29 : vector<8x128xi1>, vector<8x128xf32>
    %c0_21 = arith.constant 0 : index
    %c0_22 = arith.constant 0 : index
    %31 = vector.load %arg8[%c0_21, %c0_22] : memref<128x128xf32, #tpu.memory_space<vmem>>, vector<128x128xf32>
    %cst_23 = arith.constant dense<0.000000e+00> : vector<8x128xf32>
    %32 = tpu.matmul %30, %31, %cst_23 {dimension_numbers = #tpu.dot_dimension_numbers<[1], [0], [0], [1], [0, 0, 1, 1], [], []>} : vector<8x128xf32>, vector<128x128xf32>, vector<8x128xf32> -> vector<8x128xf32>
    %c0_24 = arith.constant 0 : index
    %c0_25 = arith.constant 0 : index
    %33 = vector.load %arg9[%c0_24, %c0_25] : memref<1x128xf32, #tpu.memory_space<vmem>>, vector<1x128xf32>
    %34 = vector.broadcast %33 : vector<1x128xf32> to vector<8x128xf32>
    %35 = arith.addf %32, %34 : vector<8x128xf32>
    %c0_26 = arith.constant 0 : index
    %c0_27 = arith.constant 0 : index
    %36 = vector.load %arg10[%c0_26, %c0_27] : memref<8x128xf32, #tpu.memory_space<vmem>>, vector<8x128xf32>
    tpu.vector_store %arg10[%c0_26, %c0_27], %35 {strides = array<i32>} : memref<8x128xf32, #tpu.memory_space<vmem>>, vector<8x128xf32>,
    return
  }
  func.func @transform_0(%arg0: i32) -> (i32, i32) {
    %c0_i32 = arith.constant 0 : i32
    %c0_i32_0 = arith.constant 0 : i32
    return %arg0, %c0_i32 : i32, i32
  }
  func.func @transform_1(%arg0: i32) -> (i32, i32) {
    %c0_i32 = arith.constant 0 : i32
    %c0_i32_0 = arith.constant 0 : i32
    %c0_i32_1 = arith.constant 0 : i32
    return %c0_i32, %c0_i32_0 : i32, i32
  }
  func.func @transform_2(%arg0: i32) -> (i32, i32) {
    %c0_i32 = arith.constant 0 : i32
    %c0_i32_0 = arith.constant 0 : i32
    %c0_i32_1 = arith.constant 0 : i32
    return %c0_i32, %c0_i32_0 : i32, i32
  }
  func.func @transform_3(%arg0: i32) -> (i32, i32) {
    %c0_i32 = arith.constant 0 : i32
    %c0_i32_0 = arith.constant 0 : i32
    %c0_i32_1 = arith.constant 0 : i32
    return %c0_i32, %c0_i32_0 : i32, i32
  }
  func.func @transform_4(%arg0: i32) -> (i32, i32) {
    %c0_i32 = arith.constant 0 : i32
    %c0_i32_0 = arith.constant 0 : i32
    %c0_i32_1 = arith.constant 0 : i32
    return %c0_i32, %c0_i32_0 : i32, i32
  }
  func.func @transform_5(%arg0: i32) -> (i32, i32) {
    %c0_i32 = arith.constant 0 : i32
    %c0_i32_0 = arith.constant 0 : i32
    %c0_i32_1 = arith.constant 0 : i32
    return %c0_i32, %c0_i32_0 : i32, i32
  }
  func.func @transform_6(%arg0: i32) -> (i32, i32) {
    %c0_i32 = arith.constant 0 : i32
    %c0_i32_0 = arith.constant 0 : i32
    %c0_i32_1 = arith.constant 0 : i32
    return %c0_i32, %c0_i32_0 : i32, i32
  }
  func.func @transform_7(%arg0: i32) -> (i32, i32) {
    %c0_i32 = arith.constant 0 : i32
    %c0_i32_0 = arith.constant 0 : i32
    %c0_i32_1 = arith.constant 0 : i32
    return %c0_i32, %c0_i32_0 : i32, i32
  }
  func.func @transform_8(%arg0: i32) -> (i32, i32) {
    %c0_i32 = arith.constant 0 : i32
    %c0_i32_0 = arith.constant 0 : i32
    %c0_i32_1 = arith.constant 0 : i32
    return %c0_i32, %c0_i32_0 : i32, i32
  }
  func.func @transform_9(%arg0: i32) -> (i32, i32) {
    %c0_i32 = arith.constant 0 : i32
    %c0_i32_0 = arith.constant 0 : i32
    return %arg0, %c0_i32 : i32, i32
  }
}

</mosaic_0001>

<bundles_post_ra>
// kernel: discriminator_forward.1
= control target key start
LH: loop header
LB: loop body
LE: loop exit
PB: predicated region body
PF: predicated region fallthrough
CT: control target
= control target key end

     0   :  { %vm783_vm2 = vmmov 0   ;;  %s1256_s1 = inlined_call_operand.vmem [shape: f32[256,256], index: 1, kind: input, shape index: {}]   ;;  %s1257_s0 = inlined_call_operand.vmem [shape: f32[8,256], index: 0, kind: input, shape index: {}]   ;;  %s1258_s3 = inlined_call_operand.vmem [shape: f32[256,128], index: 3, kind: input, shape index: {}]   ;;  %s1259_s2 = inlined_call_operand.vmem [shape: f32[1,256], index: 2, kind: input, shape index: {}]   ;;  %s1260_s5 = inlined_call_operand.vmem [shape: f32[128,128], index: 5, kind: input, shape index: {}]   ;;  %s1261_s7 = inlined_call_operand.vmem [shape: f32[128,128], index: 7, kind: input, shape index: {}]   ;;  %s1262_s4 = inlined_call_operand.vmem [shape: f32[1,128], index: 4, kind: input, shape index: {}]   ;;  %s1263_s6 = inlined_call_operand.vmem [shape: f32[1,128], index: 6, kind: input, shape index: {}]   ;;  %s1264_s8 = inlined_call_operand.vmem [shape: f32[1,128], index: 8, kind: input, shape index: {}]   ;;  %s1265_s9 = inlined_call_operand.vmem [shape: f32[8,128], index: 9, kind: output, shape index: {}]  }
   0x1   :  { %v35_v0 = vld [vmem:[%s1256_s1 + $0x8] sm:$0xff]  ;;  %v37_v1 = vld [vmem:[%s1256_s1 + $0x18] sm:$0xff]  ;;  %v34_v2 = vld [vmem:[%s1256_s1] sm:$0xff] }
   0x2   :  { %v635_v3 = vpack.c.bf16 %v37_v1, %v35_v0  ;;  %v36_v4 = vld [vmem:[%s1256_s1 + $0x10] sm:$0xff]  ;;  %v39_v5 = vld [vmem:[%s1256_s1 + $0x28] sm:$0xff]  ;;  %v41_v6 = vld [vmem:[%s1256_s1 + $0x38] sm:$0xff] }
   0x3   :  { %v637_v7 = vpack.c.bf16 %v36_v4, %v34_v2  ;;  %v639_v8 = vpack.c.bf16 %v41_v6, %v39_v5  ;;  %v38_v9 = vld [vmem:[%s1256_s1 + $0x20] sm:$0xff]  ;;  %v40_v10 = vld [vmem:[%s1256_s1 + $0x30] sm:$0xff]  ;;  %v43_v11 = vld [vmem:[%s1256_s1 + $0x48] sm:$0xff] }
   0x4   :  { %636 = vmatprep.subr.bf16.mxu0 %v635_v3  ;;  %v45_v12 = vld [vmem:[%s1256_s1 + $0x58] sm:$0xff]  ;;  %v641_v13 = vpack.c.bf16 %v40_v10, %v38_v9  ;;  %v42_v15 = vld [vmem:[%s1256_s1 + $0x40] sm:$0xff]  ;;  %v44_v16 = vld [vmem:[%s1256_s1 + $0x50] sm:$0xff] }
   0x5   :  { %638 = vmatpush1.bf16.msra.mxu0 %v637_v7  ;;  %v643_v14 = vpack.c.bf16 %v45_v12, %v43_v11  ;;  %v47_v17 = vld [vmem:[%s1256_s1 + $0x68] sm:$0xff]  ;;  %v49_v18 = vld [vmem:[%s1256_s1 + $0x78] sm:$0xff]  ;;  %v645_v19 = vpack.c.bf16 %v44_v16, %v42_v15  ;;  %v46_v21 = vld [vmem:[%s1256_s1 + $0x60] sm:$0xff] }
   0x6   :  { %640 = vmatprep.subr.bf16.mxu0 %v639_v8  ;;  %v647_v20 = vpack.c.bf16 %v49_v18, %v47_v17  ;;  %v48_v22 = vld [vmem:[%s1256_s1 + $0x70] sm:$0xff]  ;;  %v51_v23 = vld [vmem:[%s1256_s1 + $0x88] sm:$0xff]  ;;  %v53_v24 = vld [vmem:[%s1256_s1 + $0x98] sm:$0xff] }
   0x7   :  { %v649_v25 = vpack.c.bf16 %v48_v22, %v46_v21  ;;  %v651_v26 = vpack.c.bf16 %v53_v24, %v51_v23  ;;  %v50_v27 = vld [vmem:[%s1256_s1 + $0x80] sm:$0xff]  ;;  %v52_v28 = vld [vmem:[%s1256_s1 + $0x90] sm:$0xff]  ;;  %v55_v29 = vld [vmem:[%s1256_s1 + $0xa8] sm:$0xff] }
   0x8   :  { %v57_v30 = vld [vmem:[%s1256_s1 + $0xb8] sm:$0xff]  ;;  %v653_v31 = vpack.c.bf16 %v52_v28, %v50_v27  ;;  %v54_v33 = vld [vmem:[%s1256_s1 + $0xa0] sm:$0xff]  ;;  %v56_v34 = vld [vmem:[%s1256_s1 + $0xb0] sm:$0xff] }
   0x9   :  { %642 = vmatpush1.bf16.msra.mxu0 %v641_v13  ;;  %v655_v32 = vpack.c.bf16 %v57_v30, %v55_v29  ;;  %v59_v35 = vld [vmem:[%s1256_s1 + $0xc8] sm:$0xff]  ;;  %v61_v36 = vld [vmem:[%s1256_s1 + $0xd8] sm:$0xff]  ;;  %v657_v37 = vpack.c.bf16 %v56_v34, %v54_v33  ;;  %v58_v38 = vld [vmem:[%s1256_s1 + $0xc0] sm:$0xff] }
   0xa   :  { %644 = vmatprep.subr.bf16.mxu0 %v643_v14  ;;  %v60_v39 = vld [vmem:[%s1256_s1 + $0xd0] sm:$0xff]  ;;  %v659_v40 = vpack.c.bf16 %v61_v36, %v59_v35  ;;  %v63_v41 = vld [vmem:[%s1256_s1 + $0xe8] sm:$0xff]  ;;  %v65_v42 = vld [vmem:[%s1256_s1 + $0xf8] sm:$0xff] }
   0xb   :  { %v33_v43 = vld [vmem:[%s1257_s0 + $0x8] sm:$0xff]  ;;  %v203_v44 = vld [vmem:[%s1258_s3 + $0x80] sm:$0xff]  ;;  %v205_v49 = vld [vmem:[%s1258_s3 + $0x90] sm:$0xff]  ;;  %v661_v51 = vpack.c.bf16 %v60_v39, %v58_v38  ;;  %v663_v57 = vpack.c.bf16 %v65_v42, %v63_v41 }
   0xc   :  { %174 = vmatprep.mubr.f32.mxu0 %v33_v43  ;;  %v204_v45 = vld [vmem:[%s1258_s3 + $0x88] sm:$0xff]  ;;  %v187_v46 = vld [vmem:[%s1258_s3] sm:$0xff]  ;;  %v206_v50 = vld [vmem:[%s1258_s3 + $0x98] sm:$0xff] }
   0xd   :  { %646 = vmatpush1.bf16.msra.mxu0 %v645_v19  ;;  %v699_v47 = vpack.c.bf16 %v204_v45, %v203_v44  ;;  %v188_v48 = vld [vmem:[%s1258_s3 + $0x8] sm:$0xff]  ;;  %v703_v53 = vpack.c.bf16 %v206_v50, %v205_v49  ;;  %v189_v54 = vld [vmem:[%s1258_s3 + $0x10] sm:$0xff]  ;;  %v190_v55 = vld [vmem:[%s1258_s3 + $0x18] sm:$0xff] }
   0xe   :  { %648 = vmatprep.subr.bf16.mxu0 %v647_v20  ;;  %v701_v52 = vpack.c.bf16 %v188_v48, %v187_v46  ;;  %v207_v56 = vld [vmem:[%s1258_s3 + $0xa0] sm:$0xff]  ;;  %v64_v59 = vld [vmem:[%s1256_s1 + $0xf0] sm:$0xff]  ;;  %v208_v60 = vld [vmem:[%s1258_s3 + $0xa8] sm:$0xff]  ;;  %v705_v63 = vpack.c.bf16 %v190_v55, %v189_v54 }
   0xf   :  { %v62_v58 = vld [vmem:[%s1256_s1 + $0xe0] sm:$0xff]  ;;  %700 = vmatprep.subr.bf16.mxu1 %v699_v47  ;;  %v67_v61 = vld [vmem:[%s1256_s1 + $0x108] sm:$0xff]  ;;  %v69_v62 = vld [vmem:[%s1256_s1 + $0x118] sm:$0xff]  ;;  %v707_v0 = vpack.c.bf16 %v208_v60, %v207_v56 }
  0x10   :  { %702 = vmatpush3.bf16.msra.mxu1 %v701_v52  ;;  %v191_v1 = vld [vmem:[%s1258_s3 + $0x20] sm:$0xff]  ;;  %v192_v2 = vld [vmem:[%s1258_s3 + $0x28] sm:$0xff]  ;;  %v665_v3 = vpack.c.bf16 %v64_v59, %v62_v58  ;;  %v209_v4 = vld [vmem:[%s1258_s3 + $0xb0] sm:$0xff]  ;;  %v667_v6 = vpack.c.bf16 %v69_v62, %v67_v61 }
  0x11   :  { %650 = vmatpush1.bf16.msra.mxu0 %v649_v25  ;;  %704 = vmatprep.subr.bf16.mxu1 %v703_v53  ;;  %v210_v5 = vld [vmem:[%s1258_s3 + $0xb8] sm:$0xff]  ;;  %v66_v7 = vld [vmem:[%s1256_s1 + $0x100] sm:$0xff]  ;;  %v68_v8 = vld [vmem:[%s1256_s1 + $0x110] sm:$0xff]  ;;  %v709_v11 = vpack.c.bf16 %v192_v2, %v191_v1 }
  0x12   :  { %652 = vmatprep.subr.bf16.mxu0 %v651_v26  ;;  %v71_v9 = vld [vmem:[%s1256_s1 + $0x128] sm:$0xff]  ;;  %v73_v10 = vld [vmem:[%s1256_s1 + $0x138] sm:$0xff]  ;;  %v711_v12 = vpack.c.bf16 %v210_v5, %v209_v4  ;;  %v193_v13 = vld [vmem:[%s1258_s3 + $0x30] sm:$0xff]  ;;  %v669_v15 = vpack.c.bf16 %v68_v8, %v66_v7 }
  0x13   :  { %v194_v14 = vld [vmem:[%s1258_s3 + $0x38] sm:$0xff]  ;;  %v211_v16 = vld [vmem:[%s1258_s3 + $0xc0] sm:$0xff]  ;;  %v212_v17 = vld [vmem:[%s1258_s3 + $0xc8] sm:$0xff]  ;;  %v671_v18 = vpack.c.bf16 %v73_v10, %v71_v9 }
  0x14   :  { %706 = vmatpush3.bf16.msra.mxu1 %v705_v63  ;;  %v70_v19 = vld [vmem:[%s1256_s1 + $0x120] sm:$0xff]  ;;  %v72_v20 = vld [vmem:[%s1256_s1 + $0x130] sm:$0xff]  ;;  %v75_v21 = vld [vmem:[%s1256_s1 + $0x148] sm:$0xff]  ;;  %v713_v23 = vpack.c.bf16 %v194_v14, %v193_v13  ;;  %v715_v24 = vpack.c.bf16 %v212_v17, %v211_v16 }
  0x15   :  { %654 = vmatpush1.bf16.msra.mxu0 %v653_v31  ;;  %708 = vmatprep.subr.bf16.mxu1 %v707_v0  ;;  %v77_v22 = vld [vmem:[%s1256_s1 + $0x158] sm:$0xff]  ;;  %v195_v25 = vld [vmem:[%s1258_s3 + $0x40] sm:$0xff]  ;;  %v196_v26 = vld [vmem:[%s1258_s3 + $0x48] sm:$0xff]  ;;  %v673_v27 = vpack.c.bf16 %v72_v20, %v70_v19  ;;  %v100_v19 = vlaneseq }
  0x16   :  { %656 = vmatprep.subr.bf16.mxu0 %v655_v32  ;;  %v213_v28 = vld [vmem:[%s1258_s3 + $0xd0] sm:$0xff]  ;;  %v214_v29 = vld [vmem:[%s1258_s3 + $0xd8] sm:$0xff]  ;;  %v675_v30 = vpack.c.bf16 %v77_v22, %v75_v21  ;;  %v74_v31 = vld [vmem:[%s1256_s1 + $0x140] sm:$0xff]  ;;  %v717_v35 = vpack.c.bf16 %v196_v26, %v195_v25 }
  0x17   :  { %v76_v32 = vld [vmem:[%s1256_s1 + $0x150] sm:$0xff]  ;;  %v79_v33 = vld [vmem:[%s1256_s1 + $0x168] sm:$0xff]  ;;  %v81_v34 = vld [vmem:[%s1256_s1 + $0x178] sm:$0xff]  ;;  %v719_v36 = vpack.c.bf16 %v214_v29, %v213_v28  ;;  %v101_v20 = vshrl.u32 %v100_v19, 7 }
  0x18   :  { %710 = vmatpush3.bf16.msra.mxu1 %v709_v11  ;;  %v198_v38 = vld [vmem:[%s1258_s3 + $0x58] sm:$0xff]  ;;  %v677_v39 = vpack.c.bf16 %v76_v32, %v74_v31  ;;  %v78_v41 = vld [vmem:[%s1256_s1 + $0x160] sm:$0xff]  ;;  %v80_v42 = vld [vmem:[%s1256_s1 + $0x170] sm:$0xff] }
  0x19   :  { %658 = vmatpush1.bf16.msra.mxu0 %v657_v37  ;;  %712 = vmatprep.subr.bf16.mxu1 %v711_v12  ;;  %v197_v37 = vld [vmem:[%s1258_s3 + $0x50] sm:$0xff]  ;;  %v83_v43 = vld [vmem:[%s1256_s1 + $0x188] sm:$0xff]  ;;  %v85_v44 = vld [vmem:[%s1256_s1 + $0x198] sm:$0xff]  ;;  %v681_v46 = vpack.c.bf16 %v80_v42, %v78_v41  ;;  %v102_v21 = vsub.s32 0, %v101_v20 }
  0x1a   :  { %660 = vmatprep.subr.bf16.mxu0 %v659_v40  ;;  %v679_v40 = vpack.c.bf16 %v81_v34, %v79_v33  ;;  %v721_v45 = vpack.c.bf16 %v198_v38, %v197_v37  ;;  %v683_v47 = vpack.c.bf16 %v85_v44, %v83_v43  ;;  %v82_v48 = vld [vmem:[%s1256_s1 + $0x180] sm:$0xff]  ;;  %v84_v49 = vld [vmem:[%s1256_s1 + $0x190] sm:$0xff]  ;;  %v87_v50 = vld [vmem:[%s1256_s1 + $0x1a8] sm:$0xff] }
  0x1b   :  { %v685_v52 = vpack.c.bf16 %v84_v49, %v82_v48  ;;  %v86_v54 = vld [vmem:[%s1256_s1 + $0x1a0] sm:$0xff]  ;;  %v88_v55 = vld [vmem:[%s1256_s1 + $0x1b0] sm:$0xff]  ;;  %v91_v56 = vld [vmem:[%s1256_s1 + $0x1c8] sm:$0xff] }
  0x1c   :  { %714 = vmatpush3.bf16.msra.mxu1 %v713_v23  ;;  %v689_v58 = vpack.c.bf16 %v88_v55, %v86_v54  ;;  %v90_v60 = vld [vmem:[%s1256_s1 + $0x1c0] sm:$0xff]  ;;  %v92_v61 = vld [vmem:[%s1256_s1 + $0x1d0] sm:$0xff]  ;;  %v95_v62 = vld [vmem:[%s1256_s1 + $0x1e8] sm:$0xff]  ;;  %v106_v23 = vsub.s32 1, %v101_v20 }
  0x1d   :  { %662 = vmatpush1.bf16.msra.mxu0 %v661_v51  ;;  %716 = vmatprep.subr.bf16.mxu1 %v715_v24  ;;  %v89_v51 = vld [vmem:[%s1256_s1 + $0x1b8] sm:$0xff]  ;;  %v693_v0 = vpack.c.bf16 %v92_v61, %v90_v60  ;;  %v94_v2 = vld [vmem:[%s1256_s1 + $0x1e0] sm:$0xff]  ;;  %v216_v7 = vld [vmem:[%s1258_s3 + $0xe8] sm:$0xff] }
  0x1e   :  { %664 = vmatprep.subr.bf16.mxu0 %v663_v57  ;;  %v687_v53 = vpack.c.bf16 %v89_v51, %v87_v50  ;;  %v93_v57 = vld [vmem:[%s1256_s1 + $0x1d8] sm:$0xff]  ;;  %v32_v5 = vld [vmem:[%s1257_s0] sm:$0xff]  ;;  %v200_v10 = vld [vmem:[%s1258_s3 + $0x68] sm:$0xff] }
  0x1f   :  { %v691_v59 = vpack.c.bf16 %v93_v57, %v91_v56  ;;  %v97_v63 = vld [vmem:[%s1256_s1 + $0x1f8] sm:$0xff]  ;;  %v199_v9 = vld [vmem:[%s1258_s3 + $0x60] sm:$0xff]  ;;  %v217_v12 = vld [vmem:[%s1258_s3 + $0xf0] sm:$0xff] }
  0x20   :  { %718 = vmatpush3.bf16.msra.mxu1 %v717_v35  ;;  %v695_v1 = vpack.c.bf16 %v97_v63, %v95_v62  ;;  %v725_v11 = vpack.c.bf16 %v200_v10, %v199_v9  ;;  %v218_v13 = vld [vmem:[%s1258_s3 + $0xf8] sm:$0xff]  ;;  %v98_v22 = vld [vmem:[%s1259_s2] sm:$0x3]  ;;  %v300_v31 = vld [vmem:[%s1260_s5 + $0x8] sm:$0xff] }
  0x21   :  { %666 = vmatpush1.bf16.msra.mxu0 %v665_v3  ;;  %720 = vmatprep.subr.bf16.mxu1 %v719_v36  ;;  %v96_v3 = vld [vmem:[%s1256_s1 + $0x1f0] sm:$0xff]  ;;  %v727_v14 = vpack.c.bf16 %v218_v13, %v217_v12  ;;  %v202_v16 = vld [vmem:[%s1258_s3 + $0x78] sm:$0xff]  ;;  %v103_v24 = vrot.slane %v98_v22, %v102_v21  ;;  %v107_v25 = vrot.slane %v98_v22, %v106_v23  ;;  %v304_v41 = vld [vmem:[%s1260_s5 + $0x28] sm:$0xff] }
  0x22   :  { %668 = vmatprep.subr.bf16.mxu0 %v667_v6  ;;  %v697_v4 = vpack.c.bf16 %v96_v3, %v94_v2  ;;  %v215_v6 = vld [vmem:[%s1258_s3 + $0xe0] sm:$0xff]  ;;  %v301_v36 = vld [vmem:[%s1260_s5 + $0x10] sm:$0xff]  ;;  %v302_v37 = vld [vmem:[%s1260_s5 + $0x18] sm:$0xff] }
  0x23   :  { %v723_v8 = vpack.c.bf16 %v216_v7, %v215_v6  ;;  %v305_v43 = vld [vmem:[%s1260_s5 + $0x30] sm:$0xff]  ;;  %v306_v44 = vld [vmem:[%s1260_s5 + $0x38] sm:$0xff]  ;;  %v396_v60 = vld [vmem:[%s1261_s7 + $0x8] sm:$0xff] }
  0x24   :  { %722 = vmatpush3.bf16.msra.mxu1 %v721_v45  ;;  %v741_v45 = vpack.c.bf16 %v306_v44, %v305_v43  ;;  %v309_v49 = vld [vmem:[%s1260_s5 + $0x50] sm:$0xff]  ;;  %v310_v50 = vld [vmem:[%s1260_s5 + $0x58] sm:$0xff]  ;;  %v400_v2 = vld [vmem:[%s1261_s7 + $0x28] sm:$0xff] }
  0x25   :  { %670 = vmatpush1.bf16.msra.mxu0 %v669_v15  ;;  %724 = vmatprep.subr.bf16.mxu1 %v723_v8  ;;  %v201_v15 = vld [vmem:[%s1258_s3 + $0x70] sm:$0xff]  ;;  %v747_v51 = vpack.c.bf16 %v310_v50, %v309_v49  ;;  %v314_v56 = vld [vmem:[%s1260_s5 + $0x78] sm:$0xff]  ;;  %v403_v7 = vld [vmem:[%s1261_s7 + $0x40] sm:$0xff] }
  0x26   :  { %672 = vmatprep.subr.bf16.mxu0 %v671_v18  ;;  %v729_v17 = vpack.c.bf16 %v202_v16, %v201_v15  ;;  %v782_v18 = vmov 0.0|0.0   ;;  %v313_v55 = vld [vmem:[%s1260_s5 + $0x70] sm:$0xff]  ;;  %v398_v63 = vld [vmem:[%s1261_s7 + $0x18] sm:$0xff]  ;;  %v404_v8 = vld [vmem:[%s1261_s7 + $0x48] sm:$0xff] }
  0x27   :  { %v753_v57 = vpack.c.bf16 %v314_v56, %v313_v55  ;;  %v397_v61 = vld [vmem:[%s1261_s7 + $0x10] sm:$0xff]  ;;  %v768_v9 = vpack.c.bf16 %v404_v8, %v403_v7  ;;  %v407_v13 = vld [vmem:[%s1261_s7 + $0x60] sm:$0xff] }
  0x28   :  { %726 = vmatpush3.bf16.msra.mxu1 %v725_v11  ;;  %v405_v10 = vld [vmem:[%s1261_s7 + $0x50] sm:$0xff]  ;;  %v406_v11 = vld [vmem:[%s1261_s7 + $0x58] sm:$0xff] }
  0x29   :  { %674 = vmatpush1.bf16.msra.mxu0 %v673_v27  ;;  %728 = vmatprep.subr.bf16.mxu1 %v727_v14  ;;  %v771_v12 = vpack.c.bf16 %v406_v11, %v405_v10  ;;  %v408_v14 = vld [vmem:[%s1261_s7 + $0x68] sm:$0xff] }
  0x2a   :  { %676 = vmatprep.subr.bf16.mxu0 %v675_v30  ;;  %v299_v30 = vld [vmem:[%s1260_s5] sm:$0xff]  ;;  %v774_v15 = vpack.c.bf16 %v408_v14, %v407_v13 }
  0x2b   :  { %v732_v34 = vpack.c.bf16 %v300_v31, %v299_v30 }
  0x2c   :  { %730 = vmatpush3.bf16.msra.mxu1 %v729_v17  ;;  %v493_v17 = vld [vmem:[%s1262_s4] ss:$0 sm:$0xff] }
  0x2d   :  { %678 = vmatpush1.bf16.msra.mxu0 %v677_v39  ;;  %731 = vmatprep.subr.bf16.mxu1 %v782_v18  ;;  %v735_v39 = vpack.c.bf16 %v302_v37, %v301_v36 }
  0x2e   :  { %680 = vmatprep.subr.bf16.mxu0 %v679_v40  ;;  %v303_v40 = vld [vmem:[%s1260_s5 + $0x20] sm:$0xff] }
  0x2f   :  { %v738_v42 = vpack.c.bf16 %v304_v41, %v303_v40 }
  0x31   :  { %682 = vmatpush1.bf16.msra.mxu0 %v681_v46  ;;  %v307_v46 = vld [vmem:[%s1260_s5 + $0x40] sm:$0xff] }
  0x32   :  { %684 = vmatprep.subr.bf16.mxu0 %v683_v47  ;;  %v308_v47 = vld [vmem:[%s1260_s5 + $0x48] sm:$0xff] }
  0x33   :  { %v744_v48 = vpack.c.bf16 %v308_v47, %v307_v46 }
  0x35   :  { %686 = vmatpush1.bf16.msra.mxu0 %v685_v52  ;;  %v311_v52 = vld [vmem:[%s1260_s5 + $0x60] sm:$0xff] }
  0x36   :  { %688 = vmatprep.subr.bf16.mxu0 %v687_v53  ;;  %v312_v53 = vld [vmem:[%s1260_s5 + $0x68] sm:$0xff] }
  0x37   :  { %v750_v54 = vpack.c.bf16 %v312_v53, %v311_v52 }
  0x39   :  { %690 = vmatpush1.bf16.msra.mxu0 %v689_v58  ;;  %v784_v58 = vmov 0.0  }
  0x3a   :  { %692 = vmatprep.subr.bf16.mxu0 %v691_v59  ;;  %v395_v59 = vld [vmem:[%s1261_s7] sm:$0xff] }
  0x3b   :  { %v756_v62 = vpack.c.bf16 %v396_v60, %v395_v59 }
  0x3d   :  { %694 = vmatpush1.bf16.msra.mxu0 %v693_v0  ;;  %v759_v0 = vpack.c.bf16 %v398_v63, %v397_v61 }
  0x3e   :  { %696 = vmatprep.subr.bf16.mxu0 %v695_v1  ;;  %v399_v1 = vld [vmem:[%s1261_s7 + $0x20] sm:$0xff] }
  0x3f   :  { %v762_v3 = vpack.c.bf16 %v400_v2, %v399_v1 }
  0x41   :  { %698 = vmatpush1.bf16.msra.mxu0 %v697_v4  ;;  %v401_v4 = vld [vmem:[%s1261_s7 + $0x30] sm:$0xff] }
  0x42   :  { %755 = vmatprep.subr.bf16.mxu0 %v782_v18 }
  0x44   :  { %175 = vmatmul.mubr.f32.vlgmr.msra.gmra.mrb[0].mxu0 %v32_v5  ;;  %v402_v5 = vld [vmem:[%s1261_s7 + $0x38] sm:$0xff] }
  0x45   :  { %632 = vmatprep.mubr.msk.f32.mxu0 %vm783_vm2, %v784_v58  ;;  %757 = vmatpush3.bf16.msra.mxu0 %v756_v62  ;;  %v765_v6 = vpack.c.bf16 %v402_v5, %v401_v4 }
  0x46   :  { %758 = vmatprep.subr.bf16.mxu0 %v782_v18 }
  0x49   :  { %760 = vmatpush3.bf16.msra.mxu0 %v759_v0 }
  0x4a   :  { %761 = vmatprep.subr.bf16.mxu0 %v782_v18 }
  0x4d   :  { %763 = vmatpush3.bf16.msra.mxu0 %v762_v3 }
  0x4e   :  { %764 = vmatprep.subr.bf16.mxu0 %v782_v18 }
  0x51   :  { %766 = vmatpush3.bf16.msra.mxu0 %v765_v6 }
  0x52   :  { %767 = vmatprep.subr.bf16.mxu0 %v782_v18 }
  0x55   :  { %769 = vmatpush3.bf16.msra.mxu0 %v768_v9 }
  0x56   :  { %770 = vmatprep.subr.bf16.mxu0 %v782_v18 }
  0x59   :  { %772 = vmatpush3.bf16.msra.mxu0 %v771_v12 }
  0x5a   :  { %773 = vmatprep.subr.bf16.mxu0 %v782_v18 }
  0x5d   :  { %775 = vmatpush3.bf16.msra.mxu0 %v774_v15 }
  0x5e   :  { %776 = vmatprep.subr.bf16.mxu0 %v782_v18 }
 0x117   :  { %v176_v26 = vpop.f32.mrb[0].mxu0 }
 0x118   :  { %v177_v27 = vadd.f32 %v176_v26, %v103_v24  ;;  %v178_v28 = vpop.f32.mrb[1].mxu0  ;;  %v409_v24 = vld [vmem:[%s1261_s7 + $0x70] sm:$0xff]  ;;  %v494_v26 = vld [vmem:[%s1263_s6] ss:$0 sm:$0xff] }
 0x119   :  { %v179_v29 = vadd.f32 %v178_v28, %v107_v25 }
 0x11a   :  { %v183_v32 = vmul.f32 0.01, %v177_v27  ;;  %vm181_vm1 = vcmp.gt.f32.partialorder %v177_v27, 0.0 }
 0x11b   :  { %vm182_vm0 = vcmp.gt.f32.partialorder %v179_v29, 0.0  ;;  %v184_v33 = vmul.f32 0.01, %v179_v29 }
 0x11c   :  { %v185_v38 = vsel %vm181_vm1, %v177_v27, %v183_v32  ;;  %v495_v32 = vld [vmem:[%s1264_s8] ss:$0 sm:$0xff] }
 0x11d   :  { %v186_v35 = vsel %vm182_vm0, %v179_v29, %v184_v33 }
 0x11e   :  { %290 = vmatprep.mubr.f32.mxu1 %v186_v35 }
 0x11f   :  { %291 = vmatmul.mubr.f32.vlgmr.msra.gmra.mrb[0].mxu1 %v185_v38 }
 0x120   :  { %733 = vmatpush3.bf16.msra.mxu1 %v732_v34  ;;  %597 = vmatprep.mubr.msk.f32.mxu1 %vm783_vm2, %v784_v58 }
 0x121   :  { %734 = vmatprep.subr.bf16.mxu1 %v782_v18 }
 0x124   :  { %736 = vmatpush3.bf16.msra.mxu1 %v735_v39 }
 0x125   :  { %737 = vmatprep.subr.bf16.mxu1 %v782_v18 }
 0x128   :  { %739 = vmatpush3.bf16.msra.mxu1 %v738_v42 }
 0x129   :  { %740 = vmatprep.subr.bf16.mxu1 %v782_v18 }
 0x12c   :  { %742 = vmatpush3.bf16.msra.mxu1 %v741_v45 }
 0x12d   :  { %743 = vmatprep.subr.bf16.mxu1 %v782_v18 }
 0x130   :  { %745 = vmatpush3.bf16.msra.mxu1 %v744_v48 }
 0x131   :  { %746 = vmatprep.subr.bf16.mxu1 %v782_v18 }
 0x134   :  { %748 = vmatpush3.bf16.msra.mxu1 %v747_v51 }
 0x135   :  { %749 = vmatprep.subr.bf16.mxu1 %v782_v18 }
 0x138   :  { %751 = vmatpush3.bf16.msra.mxu1 %v750_v54 }
 0x139   :  { %752 = vmatprep.subr.bf16.mxu1 %v782_v18  ;;  %v410_v18 = vld [vmem:[%s1261_s7 + $0x78] sm:$0xff] }
 0x13a   :  { %v777_v25 = vpack.c.bf16 %v410_v18, %v409_v24 }
 0x13c   :  { %754 = vmatpush3.bf16.msra.mxu1 %v753_v57  ;;  %778 = vmatpush3.bf16.msra.mxu0 %v777_v25 }
 0x1f2   :  { %v528_v16 = vpop.f32.mrb[0].mxu1 }
 0x1f3   :  { %v529_v19 = vpop.f32.mrb[1].mxu1 }
 0x1f4   :  { %v530_v20 = vadd.f32 %v529_v19, %v528_v16 }
 0x1f6   :  { %v293_v21 = vadd.f32 %v530_v20, %v493_v17 }
 0x1f8   :  { %v297_v22 = vmul.f32 0.01, %v293_v21  ;;  %vm296_vm3 = vcmp.gt.f32.partialorder %v293_v21, 0.0 }
 0x1fa   :  { %v298_v23 = vsel %vm296_vm3, %v293_v21, %v297_v22 }
 0x1fb   :  { %598 = vmatmul.mubr.f32.vlgmr.msra.gmra.mrb[2].mxu1 %v298_v23 }
 0x2ce   :  { %v388_v27 = vpop.f32.mrb[2].mxu1 }
 0x2cf   :  { %v389_v28 = vadd.f32 %v494_v26, %v388_v27  ;;  %v599_v29 = vpop.f32.mrb[3].mxu1 }
 0x2d1   :  { %vm392_vm4 = vcmp.gt.f32.partialorder %v389_v28, 0.0  ;;  %v393_v30 = vmul.f32 0.01, %v389_v28 }
 0x2d3   :  { %v394_v31 = vsel %vm392_vm4, %v389_v28, %v393_v30 }
 0x2d4   :  { %633 = vmatmul.mubr.f32.vlgmr.msra.gmra.mrb[2].mxu0 %v394_v31 }
 0x3a7   :  { %v484_v33 = vpop.f32.mrb[2].mxu0 }
 0x3a8   :  { %v485_v34 = vadd.f32 %v495_v32, %v484_v33  ;;  %v634_v35 = vpop.f32.mrb[3].mxu0 }
 0x3aa   :  { %488 = vst [vmem:[%s1265_s9] sm:$0xff] %v485_v34 }

</bundles_post_ra>
